<compile_context>
chip_gen: v7x
topology: tpu7x:2x2x1
jax: 0.10.0
libtpu: 0.0.40
codegen_flags: <defaults>
</compile_context>

<pallas_src>
import jax
import jax.numpy as jnp
from jax.experimental import pallas as pl
from jax.experimental.pallas import tpu as pltpu

IN_DIM = 784
HIDDEN_PAD = 128   # hidden dim 100 zero-padded to 128 lanes
OUT_PAD = 128      # output dim 10 zero-padded to 128 lanes (lane-dense store)
OUT_DIM = 10


def mlp_kernel(x_ref, w1_ref, b1_ref, w2_ref, b2_ref, w3_ref, b3_ref, o_ref):
    # layer1: (TILE_B,784)bf16 @ (784,128)bf16 -> f32 acc, bias + tanh in f32
    z1 = jnp.dot(x_ref[...], w1_ref[...], preferred_element_type=jnp.float32)
    h1 = jnp.tanh(z1 + b1_ref[...])
    # layer2: (TILE_B,128) @ (128,128), bf16 operands, f32 accumulate
    z2 = jnp.dot(h1.astype(jnp.bfloat16), w2_ref[...],
                 preferred_element_type=jnp.float32)
    h2 = jnp.tanh(z2 + b2_ref[...])
    # layer3: (TILE_B,128) @ (128,128), no activation; lane-dense 128-wide store
    z3 = jnp.dot(h2.astype(jnp.bfloat16), w3_ref[...],
                 preferred_element_type=jnp.float32)
    o_ref[...] = (z3 + b3_ref[...]).astype(o_ref.dtype)


def feedforward_net(x, padded_params, *, tile_b=512):
    """x: (B, 784) f32.  padded_params: output of prepare_params()."""
    w1, b1, w2, b2, w3, b3 = padded_params
    B = x.shape[0]
    # Tile: at most 512 rows (fits v7x 32 MiB scoped VMEM comfortably with
    # double-buffering + ~260 KB of resident bf16 weights), at least B rounded
    # up to the 8-sublane requirement so tiny demo batches don't over-pad.
    tb = min(tile_b, ((B + 7) // 8) * 8)
    b_pad = pl.cdiv(B, tb) * tb
    if b_pad != B:
        x = jnp.pad(x, ((0, b_pad - B), (0, 0)))
    x = x.astype(jnp.bfloat16)  # halve HBM bytes for the streamed input

    out = pl.pallas_call(
        mlp_kernel,
        out_shape=jax.ShapeDtypeStruct((b_pad, OUT_PAD), jnp.float32),
        grid=(b_pad // tb,),
        in_specs=[
            pl.BlockSpec((tb, IN_DIM), lambda i: (i, 0)),            # x (streamed)
            pl.BlockSpec((IN_DIM, HIDDEN_PAD), lambda i: (0, 0)),    # w1 (resident)
            pl.BlockSpec((1, HIDDEN_PAD), lambda i: (0, 0)),         # b1
            pl.BlockSpec((HIDDEN_PAD, HIDDEN_PAD), lambda i: (0, 0)),# w2
            pl.BlockSpec((1, HIDDEN_PAD), lambda i: (0, 0)),         # b2
            pl.BlockSpec((HIDDEN_PAD, OUT_PAD), lambda i: (0, 0)),   # w3
            pl.BlockSpec((1, OUT_PAD), lambda i: (0, 0)),            # b3
        ],
        out_specs=pl.BlockSpec((tb, OUT_PAD), lambda i: (i, 0)),
        compiler_params=pltpu.CompilerParams(
            dimension_semantics=("parallel",)),
    )(x, w1, b1, w2, b2, w3, b3)
    return out[:B, :OUT_DIM]


# ---------------- parameter init (mirrors the PyTorch module) ----------------

def xavier_normal(key, fan_in, fan_out):
    # torch.nn.init.xavier_normal_ (gain=1): std = sqrt(2/(fan_in+fan_out))
    std = (2.0 / (fan_in + fan_out)) ** 0.5
    # stored as (fan_in, fan_out) so the kernel does x @ W
    return std * jax.random.normal(key, (fan_in, fan_out), dtype=jnp.float32)


def linear_bias(key, fan_in, fan_out):
    # PyTorch nn.Linear default bias init: U(-1/sqrt(fan_in), 1/sqrt(fan_in))
    bound = 1.0 / (fan_in ** 0.5)
    return jax.random.uniform(
        key, (1, fan_out), minval=-bound, maxval=bound, dtype=jnp.float32)


def init_params(key):
    k = jax.random.split(key, 6)
    w1 = xavier_normal(k[0], 784, 100)
    b1 = linear_bias(k[1], 784, 100)
    w2 = xavier_normal(k[2], 100, 100)
    b2 = linear_bias(k[3], 100, 100)
    w3 = xavier_normal(k[4], 100, 10)
    b3 = linear_bias(k[5], 100, 10)
    return (w1, b1, w2, b2, w3, b3)


def prepare_params(params):
    """Zero-pad feature dims to 128 and cast weights to bf16 (biases stay f32)."""
    w1, b1, w2, b2, w3, b3 = params
    w1p = jnp.pad(w1, ((0, 0), (0, HIDDEN_PAD - 100))).astype(jnp.bfloat16)
    b1p = jnp.pad(b1, ((0, 0), (0, HIDDEN_PAD - 100)))                 # f32
    w2p = jnp.pad(w2, ((0, HIDDEN_PAD - 100), (0, HIDDEN_PAD - 100))
                  ).astype(jnp.bfloat16)
    b2p = jnp.pad(b2, ((0, 0), (0, HIDDEN_PAD - 100)))                 # f32
    w3p = jnp.pad(w3, ((0, HIDDEN_PAD - 100), (0, OUT_PAD - OUT_DIM))
                  ).astype(jnp.bfloat16)
    b3p = jnp.pad(b3, ((0, 0), (0, OUT_PAD - OUT_DIM)))                # f32
    return (w1p, b1p, w2p, b2p, w3p, b3p)


def reference(x, params):
    w1, b1, w2, b2, w3, b3 = params
    h1 = jnp.tanh(x @ w1 + b1)
    h2 = jnp.tanh(h1 @ w2 + b2)
    return h2 @ w3 + b3


if __name__ == "__main__":
    key = jax.random.PRNGKey(0)
    kx, kp = jax.random.split(key)
    B = 8
    x = jax.random.normal(kx, (B, IN_DIM), dtype=jnp.float32)
    params = init_params(kp)
    padded_params = prepare_params(params)

    out = feedforward_net(x, padded_params)
    out = jax.block_until_ready(out)

    ref = reference(x, params)  # f32 reference (original module semantics)
    assert out.shape == (B, OUT_DIM), out.shape
    # bf16 matmul operands with f32 accumulation -> relaxed tolerance vs f32 ref
    assert jnp.allclose(out, ref, atol=5e-2, rtol=5e-2), (
        "mismatch vs reference: max abs diff = %g" % float(jnp.max(jnp.abs(out - ref))))
    print("KERNEL_OK")
</pallas_src>

<mosaic_0001>
module attributes {stable_mosaic.version = 11 : i64} {
  func.func @mlp_kernel(%arg0: i32, %arg1: memref<8x784xbf16, #tpu.memory_space<vmem>>, %arg2: memref<784x128xbf16, #tpu.memory_space<vmem>>, %arg3: memref<1x128xf32, #tpu.memory_space<vmem>>, %arg4: memref<128x128xbf16, #tpu.memory_space<vmem>>, %arg5: memref<1x128xf32, #tpu.memory_space<vmem>>, %arg6: memref<128x128xbf16, #tpu.memory_space<vmem>>, %arg7: memref<1x128xf32, #tpu.memory_space<vmem>>, %arg8: memref<8x128xf32, #tpu.memory_space<vmem>>) attributes {dimension_semantics = [#tpu.dimension_semantics<parallel>], iteration_bounds = array<i64: 1>, scalar_prefetch = 0 : i64, scratch_operands = 0 : i64, tpu.core_type = #tpu.core_type<tc>, window_params = [{transform_indices = @transform_0, window_bounds = array<i64: 8, 784>}, {pipeline_mode = #tpu.pipeline_mode<synchronous>, transform_indices = @transform_1, window_bounds = array<i64: 784, 128>}, {pipeline_mode = #tpu.pipeline_mode<synchronous>, transform_indices = @transform_2, window_bounds = array<i64: 1, 128>}, {pipeline_mode = #tpu.pipeline_mode<synchronous>, transform_indices = @transform_3, window_bounds = array<i64: 128, 128>}, {pipeline_mode = #tpu.pipeline_mode<synchronous>, transform_indices = @transform_4, window_bounds = array<i64: 1, 128>}, {pipeline_mode = #tpu.pipeline_mode<synchronous>, transform_indices = @transform_5, window_bounds = array<i64: 128, 128>}, {pipeline_mode = #tpu.pipeline_mode<synchronous>, transform_indices = @transform_6, window_bounds = array<i64: 1, 128>}, {transform_indices = @transform_7, window_bounds = array<i64: 8, 128>}]} {
    %c0 = arith.constant 0 : index
    %c0_0 = arith.constant 0 : index
    %0 = vector.load %arg1[%c0, %c0_0] : memref<8x784xbf16, #tpu.memory_space<vmem>>, vector<8x784xbf16>
    %c0_1 = arith.constant 0 : index
    %c0_2 = arith.constant 0 : index
    %1 = vector.load %arg2[%c0_1, %c0_2] : memref<784x128xbf16, #tpu.memory_space<vmem>>, vector<784x128xbf16>
    %cst = arith.constant dense<0.000000e+00> : vector<8x128xf32>
    %2 = tpu.matmul %0, %1, %cst {dimension_numbers = #tpu.dot_dimension_numbers<[1], [0], [0], [1], [0, 0, 1, 1], [], []>} : vector<8x784xbf16>, vector<784x128xbf16>, vector<8x128xf32> -> vector<8x128xf32>
    %c0_3 = arith.constant 0 : index
    %c0_4 = arith.constant 0 : index
    %3 = vector.load %arg3[%c0_3, %c0_4] : memref<1x128xf32, #tpu.memory_space<vmem>>, vector<1x128xf32>
    %4 = vector.broadcast %3 : vector<1x128xf32> to vector<8x128xf32>
    %5 = arith.addf %2, %4 : vector<8x128xf32>
    %6 = math.tanh %5 : vector<8x128xf32>
    %7 = arith.truncf %6 : vector<8x128xf32> to vector<8x128xbf16>
    %c0_5 = arith.constant 0 : index
    %c0_6 = arith.constant 0 : index
    %8 = vector.load %arg4[%c0_5, %c0_6] : memref<128x128xbf16, #tpu.memory_space<vmem>>, vector<128x128xbf16>
    %cst_7 = arith.constant dense<0.000000e+00> : vector<8x128xf32>
    %9 = tpu.matmul %7, %8, %cst_7 {dimension_numbers = #tpu.dot_dimension_numbers<[1], [0], [0], [1], [0, 0, 1, 1], [], []>} : vector<8x128xbf16>, vector<128x128xbf16>, vector<8x128xf32> -> vector<8x128xf32>
    %c0_8 = arith.constant 0 : index
    %c0_9 = arith.constant 0 : index
    %10 = vector.load %arg5[%c0_8, %c0_9] : memref<1x128xf32, #tpu.memory_space<vmem>>, vector<1x128xf32>
    %11 = vector.broadcast %10 : vector<1x128xf32> to vector<8x128xf32>
    %12 = arith.addf %9, %11 : vector<8x128xf32>
    %13 = math.tanh %12 : vector<8x128xf32>
    %14 = arith.truncf %13 : vector<8x128xf32> to vector<8x128xbf16>
    %c0_10 = arith.constant 0 : index
    %c0_11 = arith.constant 0 : index
    %15 = vector.load %arg6[%c0_10, %c0_11] : memref<128x128xbf16, #tpu.memory_space<vmem>>, vector<128x128xbf16>
    %cst_12 = arith.constant dense<0.000000e+00> : vector<8x128xf32>
    %16 = tpu.matmul %14, %15, %cst_12 {dimension_numbers = #tpu.dot_dimension_numbers<[1], [0], [0], [1], [0, 0, 1, 1], [], []>} : vector<8x128xbf16>, vector<128x128xbf16>, vector<8x128xf32> -> vector<8x128xf32>
    %c0_13 = arith.constant 0 : index
    %c0_14 = arith.constant 0 : index
    %17 = vector.load %arg7[%c0_13, %c0_14] : memref<1x128xf32, #tpu.memory_space<vmem>>, vector<1x128xf32>
    %18 = vector.broadcast %17 : vector<1x128xf32> to vector<8x128xf32>
    %19 = arith.addf %16, %18 : vector<8x128xf32>
    %c0_15 = arith.constant 0 : index
    %c0_16 = arith.constant 0 : index
    %20 = vector.load %arg8[%c0_15, %c0_16] : memref<8x128xf32, #tpu.memory_space<vmem>>, vector<8x128xf32>
    tpu.vector_store %arg8[%c0_15, %c0_16], %19 {strides = array<i32>} : memref<8x128xf32, #tpu.memory_space<vmem>>, vector<8x128xf32>,
    return
  }
  func.func @transform_0(%arg0: i32) -> (i32, i32) {
    %c0_i32 = arith.constant 0 : i32
    %c0_i32_0 = arith.constant 0 : i32
    return %arg0, %c0_i32 : i32, i32
  }
  func.func @transform_1(%arg0: i32) -> (i32, i32) {
    %c0_i32 = arith.constant 0 : i32
    %c0_i32_0 = arith.constant 0 : i32
    %c0_i32_1 = arith.constant 0 : i32
    return %c0_i32, %c0_i32_0 : i32, i32
  }
  func.func @transform_2(%arg0: i32) -> (i32, i32) {
    %c0_i32 = arith.constant 0 : i32
    %c0_i32_0 = arith.constant 0 : i32
    %c0_i32_1 = arith.constant 0 : i32
    return %c0_i32, %c0_i32_0 : i32, i32
  }
  func.func @transform_3(%arg0: i32) -> (i32, i32) {
    %c0_i32 = arith.constant 0 : i32
    %c0_i32_0 = arith.constant 0 : i32
    %c0_i32_1 = arith.constant 0 : i32
    return %c0_i32, %c0_i32_0 : i32, i32
  }
  func.func @transform_4(%arg0: i32) -> (i32, i32) {
    %c0_i32 = arith.constant 0 : i32
    %c0_i32_0 = arith.constant 0 : i32
    %c0_i32_1 = arith.constant 0 : i32
    return %c0_i32, %c0_i32_0 : i32, i32
  }
  func.func @transform_5(%arg0: i32) -> (i32, i32) {
    %c0_i32 = arith.constant 0 : i32
    %c0_i32_0 = arith.constant 0 : i32
    %c0_i32_1 = arith.constant 0 : i32
    return %c0_i32, %c0_i32_0 : i32, i32
  }
  func.func @transform_6(%arg0: i32) -> (i32, i32) {
    %c0_i32 = arith.constant 0 : i32
    %c0_i32_0 = arith.constant 0 : i32
    %c0_i32_1 = arith.constant 0 : i32
    return %c0_i32, %c0_i32_0 : i32, i32
  }
  func.func @transform_7(%arg0: i32) -> (i32, i32) {
    %c0_i32 = arith.constant 0 : i32
    %c0_i32_0 = arith.constant 0 : i32
    return %arg0, %c0_i32 : i32, i32
  }
}

</mosaic_0001>

<bundles_post_ra>
// kernel: tpu_custom_call.1
= control target key start
LH: loop header
LB: loop body
LE: loop exit
PB: predicated region body
PF: predicated region fallthrough
CT: control target
= control target key end

     0   :  { %12 = vsyncpa [#allocation3], 0  ;;  %s1477_s0 = inlined_call_operand.hbm [shape: bf16[8,784], index: 0, kind: input, shape index: {}]   ;;  %s1478_s1 = inlined_call_operand.hbm [shape: bf16[784,128], index: 1, kind: input, shape index: {}]   ;;  %s1479_s2 = inlined_call_operand.vmem [shape: f32[1,128], index: 2, kind: input, shape index: {}]   ;;  %s1480_s3 = inlined_call_operand.hbm [shape: bf16[128,128], index: 3, kind: input, shape index: {}]   ;;  %s1481_s4 = inlined_call_operand.vmem [shape: f32[1,128], index: 4, kind: input, shape index: {}]   ;;  %s1482_s5 = inlined_call_operand.hbm [shape: bf16[128,128], index: 5, kind: input, shape index: {}]   ;;  %s1483_s6 = inlined_call_operand.vmem [shape: f32[1,128], index: 6, kind: input, shape index: {}]   ;;  %s1484_s7 = inlined_call_operand.hbm [shape: f32[8,128], index: 7, kind: output, shape index: {}]  }
   0x1   :  { %13 = vsyncpa [#allocation6], 0 }
   0x2   :  { %14 = vsyncpa [#allocation9], 0 }
   0x3   :  { %15 = vsyncpa [#allocation4], 0  ;;  %s1327_s24 = smov [#allocation5]   ;;  %s1209_s28 = scalar_lea.hbm %s1478_s1, 6272 }
   0x4   :  { %s31_s25 = sshll.u32 %s1327_s24, 4  ;;  %p1210_p0 = scmp.ne.s32.totalorder %s1478_s1, %s1209_s28  ;;  %s32_s25 = int_to_ptr.vmem [resolvable:$true] %s31_s25 }
   0x5   :  { %p1213_p1 = scmp.lt.u32.totalorder %s1209_s28, %s1478_s1 }
   0x7   :  { %p1215_p2 = pnand %p1213_p1, %p1210_p0 }
   0x9   :  { %1218 = shalt.err (!%p1215_p2)
}
   0xa   :  { %s1219_s10 = scalar_lea.vmem %s32_s25, 6272  ;;  %p1224_p4 = scmp.lt.s32.totalorder %s32_s25, %s32_s25 }
   0xb   :  { %p1220_p3 = scmp.ne.s32.totalorder %s32_s25, %s1219_s10  ;;  %p1225_p5 = scmp.lt.s32.totalorder %s1219_s10, %s1219_s10 }
   0xd   :  { %p1226_p6 = por %p1225_p5, %p1224_p4 }
   0xf   :  { %p1227_p7 = pnand %p1226_p6, %p1220_p3 }
  0x11   :  { %1230 = shalt.err (!%p1227_p7)
}
  0x12   :  { %s1328_s11 = smov 64   ;;  %s1329_s12 = smov 4  }
  0x13   :  { %37 = dma.hbm_to_vmem [thread:$0]  %s1478_s1, 6272, %s32_s25, [#allocation6], %s1328_s11, %s1328_s11, %s1329_s12  }
  0x14   :  { %s1330_s15 = smov [#allocation2]   ;;  %s1331_s17 = smov [#allocation7]  }
  0x15   :  { %s22_s16 = sshll.u32 %s1330_s15, 4  ;;  %s45_s18 = sshll.u32 %s1331_s17, 4  ;;  %s23_s16 = int_to_ptr.vmem [resolvable:$true] %s22_s16  ;;  %s46_s18 = int_to_ptr.vmem [resolvable:$true] %s45_s18 }
  0x16   :  { %s1231_s21 = scalar_lea.hbm %s1477_s0, 448 }
  0x17   :  { %p1232_p8 = scmp.ne.s32.totalorder %s1477_s0, %s1231_s21  ;;  %p1235_p9 = scmp.lt.u32.totalorder %s1231_s21, %s1477_s0 }
  0x19   :  { %p1237_p10 = pnand %p1235_p9, %p1232_p8 }
  0x1b   :  { %1240 = shalt.err (!%p1237_p10)
}
  0x1c   :  { %s1241_s1 = scalar_lea.vmem %s23_s16, 448  ;;  %p1246_p12 = scmp.lt.s32.totalorder %s23_s16, %s23_s16 }
  0x1d   :  { %p1242_p11 = scmp.ne.s32.totalorder %s23_s16, %s1241_s1  ;;  %p1247_p13 = scmp.lt.s32.totalorder %s1241_s1, %s1241_s1 }
  0x1f   :  { %p1248_p0 = por %p1247_p13, %p1246_p12 }
  0x21   :  { %p1249_p1 = pnand %p1248_p0, %p1242_p11 }
  0x23   :  { %1252 = shalt.err (!%p1249_p1)
}
  0x24   :  { %25 = dma.hbm_to_vmem [thread:$0]  %s1477_s0, 448, %s23_s16, [#allocation3]  }
  0x25   :  { %s1253_s30 = scalar_lea.hbm %s1480_s3, 1024 }
  0x26   :  { %p1254_p2 = scmp.ne.s32.totalorder %s1480_s3, %s1253_s30  ;;  %p1257_p3 = scmp.lt.u32.totalorder %s1253_s30, %s1480_s3 }
  0x28   :  { %p1259_p4 = pnand %p1257_p3, %p1254_p2 }
  0x2a   :  { %1262 = shalt.err (!%p1259_p4)
}
  0x2b   :  { %s1263_s14 = scalar_lea.vmem %s46_s18, 1024  ;;  %p1268_p6 = scmp.lt.s32.totalorder %s46_s18, %s46_s18 }
  0x2c   :  { %p1264_p5 = scmp.ne.s32.totalorder %s46_s18, %s1263_s14  ;;  %p1269_p7 = scmp.lt.s32.totalorder %s1263_s14, %s1263_s14 }
  0x2e   :  { %p1270_p8 = por %p1269_p7, %p1268_p6 }
  0x30   :  { %p1271_p9 = pnand %p1270_p8, %p1264_p5 }
  0x32   :  { %1274 = shalt.err (!%p1271_p9)
}
  0x33   :  { %51 = dma.hbm_to_vmem [thread:$0]  %s1480_s3, 1024, %s46_s18, [#allocation6], %s1328_s11, %s1328_s11, %s1329_s12  }
  0x34   :  { %s1332_s16 = smov [#allocation8]   ;;  %s1275_s21 = scalar_lea.hbm %s1482_s5, 1024 }
  0x35   :  { %s59_s17 = sshll.u32 %s1332_s16, 4  ;;  %p1276_p10 = scmp.ne.s32.totalorder %s1482_s5, %s1275_s21  ;;  %s60_s17 = int_to_ptr.vmem [resolvable:$true] %s59_s17 }
  0x36   :  { %p1279_p11 = scmp.lt.u32.totalorder %s1275_s21, %s1482_s5 }
  0x38   :  { %p1281_p12 = pnand %p1279_p11, %p1276_p10 }
  0x3a   :  { %1284 = shalt.err (!%p1281_p12)
}
  0x3b   :  { %s1285_s1 = scalar_lea.vmem %s60_s17, 1024  ;;  %p1290_p0 = scmp.lt.s32.totalorder %s60_s17, %s60_s17 }
  0x3c   :  { %p1286_p13 = scmp.ne.s32.totalorder %s60_s17, %s1285_s1  ;;  %p1291_p1 = scmp.lt.s32.totalorder %s1285_s1, %s1285_s1 }
  0x3e   :  { %p1292_p2 = por %p1291_p1, %p1290_p0 }
  0x40   :  { %p1293_p3 = pnand %p1292_p2, %p1286_p13 }
  0x42   :  { %1296 = shalt.err (!%p1293_p3)
}
  0x43   :  { %65 = dma.hbm_to_vmem [thread:$0]  %s1482_s5, 1024, %s60_s17, [#allocation9], %s1328_s11, %s1328_s11, %s1329_s12  }
  0x44   :  { %1319 = dma.done.wait [#allocation3], 448  }
  0x45   :  { %1320 = vsyncadd [#allocation3], 4294966848 }
  0x46   :  { %1321 = dma.done.wait [#allocation6], 7296  }
  0x47   :  { %1322 = vsyncadd [#allocation6], 4294960000 }
  0x48   :  { %1323 = dma.done.wait [#allocation9], 1024  }
  0x49   :  { %1324 = vsyncadd [#allocation9], 4294966272  ;;  %v1133_v0 = vld [vmem:[#allocation5 + $0x40] sm:$0xff]   ;;  %v1137_v4 = vld [vmem:[#allocation5 + $0x48] sm:$0xff]   ;;  %v1333_v43 = vmov 0.0   ;;  %vm1334_vm0 = vmmov 0  }
  0x4a   :  { %v1134_v1 = vld [vmem:[#allocation5] sm:$0xff]   ;;  %992 = vmatprep.subr.bf16.mxu0 %v1133_v0  ;;  %v1138_v5 = vld [vmem:[#allocation5 + $0x8] sm:$0xff]   ;;  %v1141_v8 = vld [vmem:[#allocation5 + $0x50] sm:$0xff]   ;;  %vm508_vm1 = vcmask 130048   ;;  %s1335_s28 = smov [#allocation10]  }
  0x4b   :  { %v1135_v2 = vld [vmem:[#allocation5 + $0xc0] sm:$0xff]   ;;  %993 = vmatpush3.bf16.msra.mxu0 %v1134_v1  ;;  %v1139_v6 = vld [vmem:[#allocation5 + $0xc8] sm:$0xff]   ;;  %v1142_v9 = vld [vmem:[#allocation5 + $0x10] sm:$0xff]   ;;  %s905_s29 = sshll.u32 %s1335_s28, 4  ;;  %s906_s29 = int_to_ptr.vmem [resolvable:$true] %s905_s29 }
  0x4c   :  { %v1136_v3 = vld [vmem:[#allocation5 + $0x80] sm:$0xff]   ;;  %1014 = vmatprep.subr.bf16.mxu1 %v1135_v2  ;;  %994 = vmatprep.subr.bf16.mxu0 %v1137_v4  ;;  %v1140_v7 = vld [vmem:[#allocation5 + $0x88] sm:$0xff]   ;;  %v1143_v10 = vld [vmem:[#allocation5 + $0xd0] sm:$0xff]   ;;  %p1302_p5 = scmp.lt.s32.totalorder %s906_s29, %s906_s29 }
  0x4d   :  { %1015 = vmatpush3.bf16.msra.mxu1 %v1136_v3  ;;  %v1144_v11 = vld [vmem:[#allocation5 + $0x90] sm:$0xff]   ;;  %v1145_v12 = vld [vmem:[#allocation5 + $0x58] sm:$0xff]   ;;  %v1149_v16 = vld [vmem:[#allocation5 + $0x60] sm:$0xff]  }
  0x4e   :  { %1016 = vmatprep.subr.bf16.mxu1 %v1139_v6  ;;  %v1146_v13 = vld [vmem:[#allocation5 + $0x18] sm:$0xff]   ;;  %v1150_v17 = vld [vmem:[#allocation5 + $0x20] sm:$0xff]   ;;  %v1153_v20 = vld [vmem:[#allocation5 + $0x68] sm:$0xff]  }
  0x4f   :  { %995 = vmatpush3.bf16.msra.mxu0 %v1138_v5  ;;  %v1147_v14 = vld [vmem:[#allocation5 + $0xd8] sm:$0xff]   ;;  %v1151_v18 = vld [vmem:[#allocation5 + $0xe0] sm:$0xff]   ;;  %v1154_v21 = vld [vmem:[#allocation5 + $0x28] sm:$0xff]  }
  0x50   :  { %996 = vmatprep.subr.bf16.mxu0 %v1141_v8  ;;  %v1148_v15 = vld [vmem:[#allocation5 + $0x98] sm:$0xff]   ;;  %v1152_v19 = vld [vmem:[#allocation5 + $0xa0] sm:$0xff]   ;;  %v1155_v22 = vld [vmem:[#allocation5 + $0xe8] sm:$0xff]  }
  0x51   :  { %1017 = vmatpush3.bf16.msra.mxu1 %v1140_v7  ;;  %v1156_v23 = vld [vmem:[#allocation5 + $0xa8] sm:$0xff]   ;;  %v1157_v24 = vld [vmem:[#allocation5 + $0x70] sm:$0xff]   ;;  %v1161_v28 = vld [vmem:[#allocation5 + $0x78] sm:$0xff]  }
  0x52   :  { %1018 = vmatprep.subr.bf16.mxu1 %v1143_v10  ;;  %v1158_v25 = vld [vmem:[#allocation5 + $0x30] sm:$0xff]   ;;  %v1162_v29 = vld [vmem:[#allocation5 + $0x38] sm:$0xff]   ;;  %v81_v31 = vld [vmem:[#allocation2] sm:$0xff] }
  0x53   :  { %997 = vmatpush3.bf16.msra.mxu0 %v1142_v9  ;;  %v1159_v26 = vld [vmem:[#allocation5 + $0xf0] sm:$0xff]   ;;  %v1163_v30 = vld [vmem:[#allocation5 + $0xf8] sm:$0xff]   ;;  %v917_v32 = vcombine.low %v81_v31, %v81_v31  ;;  %v918_v33 = vcombine.high %v81_v31, %v81_v31  ;;  %v1167_v35 = vld [vmem:[#allocation5 + $0x140] sm:$0xff]  }
  0x54   :  { %998 = vmatprep.subr.bf16.mxu0 %v1145_v12  ;;  %v1160_v27 = vld [vmem:[#allocation5 + $0xb0] sm:$0xff]   ;;  %v1166_v34 = vld [vmem:[#allocation5 + $0xb8] sm:$0xff]   ;;  %v1170_v39 = vld [vmem:[#allocation5 + $0x100] sm:$0xff]  }
  0x55   :  { %1019 = vmatpush3.bf16.msra.mxu1 %v1144_v11  ;;  %v82_v36 = vld [vmem:[#allocation2 + $0x8] sm:$0xff]  ;;  %544 = vmatprep.mubr.bf16.mxu0 %v918_v33  ;;  %v1175_v45 = vld [vmem:[#allocation5 + $0x158] sm:$0xff]   ;;  %v1177_v47 = vld [vmem:[#allocation5 + $0x160] sm:$0xff]  }
  0x56   :  { %1020 = vmatprep.subr.bf16.mxu1 %v1147_v14  ;;  %v919_v37 = vcombine.low %v82_v36, %v82_v36  ;;  %v920_v38 = vcombine.high %v82_v36, %v82_v36  ;;  %v1171_v40 = vld [vmem:[#allocation5 + $0x148] sm:$0xff]   ;;  %v1173_v42 = vld [vmem:[#allocation5 + $0x150] sm:$0xff]   ;;  %v1176_v46 = vld [vmem:[#allocation5 + $0x118] sm:$0xff]  }
  0x57   :  { %999 = vmatpush3.bf16.msra.mxu0 %v1146_v13  ;;  %v1172_v41 = vld [vmem:[#allocation5 + $0x108] sm:$0xff]   ;;  %v1174_v44 = vld [vmem:[#allocation5 + $0x110] sm:$0xff]   ;;  %v1178_v48 = vld [vmem:[#allocation5 + $0x120] sm:$0xff]  }
  0x58   :  { %1000 = vmatprep.subr.bf16.mxu0 %v1149_v16  ;;  %584 = vmatprep.mubr.bf16.mxu1 %v920_v38  ;;  %v1179_v49 = vld [vmem:[#allocation5 + $0x168] sm:$0xff]   ;;  %v1185_v50 = vld [vmem:[#allocation5 + $0x180] sm:$0xff]   ;;  %v83_v51 = vld [vmem:[#allocation2 + $0x10] sm:$0xff] }
  0x59   :  { %1021 = vmatpush3.bf16.msra.mxu1 %v1148_v15  ;;  %v1180_v52 = vld [vmem:[#allocation5 + $0x128] sm:$0xff]   ;;  %v922_v53 = vcombine.high %v83_v51, %v83_v51  ;;  %v1188_v54 = vld [vmem:[#allocation2 + $0x18] ss:$0 sps:$4 sm:$0xff]   ;;  %v1181_v55 = vld [vmem:[#allocation5 + $0x170] sm:$0xff]   ;;  %v921_v59 = vcombine.low %v83_v51, %v83_v51 }
  0x5a   :  { %1022 = vmatprep.subr.bf16.mxu1 %v1151_v18  ;;  %v1182_v56 = vld [vmem:[#allocation5 + $0x130] sm:$0xff]   ;;  %v1183_v57 = vld [vmem:[#allocation5 + $0x178] sm:$0xff]   ;;  %v1189_v60 = vld [vmem:[#allocation7] sm:$0xff]  }
  0x5b   :  { %1001 = vmatpush3.bf16.msra.mxu0 %v1150_v17  ;;  %v1184_v58 = vld [vmem:[#allocation5 + $0x138] sm:$0xff]   ;;  %v1190_v61 = vld [vmem:[#allocation7 + $0x8] sm:$0xff]   ;;  %v1192_v63 = vld [vmem:[#allocation7 + $0x18] sm:$0xff]  }
  0x5c   :  { %1002 = vmatprep.subr.bf16.mxu0 %v1153_v20  ;;  %v1191_v62 = vld [vmem:[#allocation7 + $0x10] sm:$0xff]   ;;  %v1193_v0 = vld [vmem:[#allocation7 + $0x20] sm:$0xff]   ;;  %v1194_v1 = vld [vmem:[#allocation7 + $0x28] sm:$0xff]  }
  0x5d   :  { %1023 = vmatpush3.bf16.msra.mxu1 %v1152_v19  ;;  %v1195_v2 = vld [vmem:[#allocation7 + $0x30] sm:$0xff]   ;;  %v1196_v3 = vld [vmem:[#allocation7 + $0x38] sm:$0xff]   ;;  %v1197_v4 = vld [vmem:[#allocation8] sm:$0xff]  }
  0x5e   :  { %1024 = vmatprep.subr.bf16.mxu1 %v1155_v22  ;;  %v1198_v5 = vld [vmem:[#allocation8 + $0x8] sm:$0xff]   ;;  %v1199_v6 = vld [vmem:[#allocation8 + $0x10] sm:$0xff]   ;;  %v1200_v7 = vld [vmem:[#allocation8 + $0x18] sm:$0xff]  }
  0x5f   :  { %1003 = vmatpush3.bf16.msra.mxu0 %v1154_v21  ;;  %v916_v9 = vld [vmem:[%s1479_s2] ss:$0 sm:$0xff]  ;;  %v1203_v36 = vld [vmem:[#allocation8 + $0x30] sm:$0xff]  }
  0x60   :  { %1004 = vmatprep.subr.bf16.mxu0 %v1157_v24  ;;  %v974_v38 = vld [vmem:[%s1481_s4] ss:$0 sm:$0xff]  ;;  %s1297_s4 = scalar_lea.vmem %s906_s29, 128 }
  0x61   :  { %1025 = vmatpush3.bf16.msra.mxu1 %v1156_v23  ;;  %p1298_p4 = scmp.ne.s32.totalorder %s906_s29, %s1297_s4  ;;  %p1303_p6 = scmp.lt.s32.totalorder %s1297_s4, %s1297_s4 }
  0x62   :  { %1026 = vmatprep.subr.bf16.mxu1 %v1159_v26 }
  0x63   :  { %1005 = vmatpush3.bf16.msra.mxu0 %v1158_v25  ;;  %p1304_p7 = por %p1303_p6, %p1302_p5 }
  0x64   :  { %1006 = vmatprep.subr.bf16.mxu0 %v1161_v28 }
  0x65   :  { %1027 = vmatpush3.bf16.msra.mxu1 %v1160_v27  ;;  %p1305_p8 = pnand %p1304_p7, %p1298_p4 }
  0x66   :  { %1028 = vmatprep.subr.bf16.mxu1 %v1163_v30 }
  0x67   :  { %1007 = vmatpush3.bf16.msra.mxu0 %v1162_v29 }
  0x68   :  { %1036 = vmatprep.subr.bf16.mxu0 %v1167_v35  ;;  %v1202_v35 = vld [vmem:[#allocation8 + $0x28] sm:$0xff]  }
  0x69   :  { %1029 = vmatpush3.bf16.msra.mxu1 %v1166_v34  ;;  %v1201_v34 = vld [vmem:[#allocation8 + $0x20] sm:$0xff]  }
  0x6a   :  { %545 = vmatmul.mubr.bf16.vlgmr.msra.gmra.mrb[0].mxu0 %v917_v32  ;;  %1078 = vmatprep.subr.bf16.mxu1 %v1333_v43 }
  0x6b   :  { %1037 = vmatpush3.bf16.msra.mxu0 %v1170_v39  ;;  %624 = vmatprep.mubr.bf16.mxu0 %v922_v53 }
  0x6c   :  { %585 = vmatmul.mubr.bf16.vlgmr.msra.gmra.mrb[0].mxu1 %v919_v37  ;;  %1038 = vmatprep.subr.bf16.mxu0 %v1171_v40  ;;  %v1204_v37 = vld [vmem:[#allocation8 + $0x38] sm:$0xff]  }
  0x6d   :  { %1080 = vmatprep.mubr.msk.bf16.mxu1 %vm1334_vm0, %v1333_v43  ;;  %1079 = vmatpush3.bf16.msra.mxu1 %v1185_v50 }
  0x6e   :  { %1084 = vmatprep.subr.bf16.mxu1 %v1333_v43 }
  0x6f   :  { %1039 = vmatpush3.bf16.msra.mxu0 %v1172_v41 }
  0x70   :  { %1040 = vmatprep.subr.bf16.mxu0 %v1173_v42 }
  0x73   :  { %1041 = vmatpush3.bf16.msra.mxu0 %v1174_v44 }
  0x74   :  { %1042 = vmatprep.subr.bf16.mxu0 %v1175_v45  ;;  %1081 = vmatmul.mubr.msk.bf16.vlgmr.msra.gmra.mrb[4].mxu1 %vm508_vm1, %v1188_v54 }
  0x75   :  { %1100 = vmatprep.mubr.msk.bf16.mxu1 %vm1334_vm0, %v1333_v43  ;;  %1085 = vmatpush3.bf16.msra.mxu1 %v1189_v60 }
  0x76   :  { %1086 = vmatprep.subr.bf16.mxu1 %v1333_v43 }
  0x77   :  { %1043 = vmatpush3.bf16.msra.mxu0 %v1176_v46 }
  0x78   :  { %1044 = vmatprep.subr.bf16.mxu0 %v1177_v47  ;;  %v983_v47 = vld [vmem:[%s1483_s6] ss:$0 sm:$0xff] }
  0x79   :  { %1087 = vmatpush3.bf16.msra.mxu1 %v1190_v61 }
  0x7a   :  { %1088 = vmatprep.subr.bf16.mxu1 %v1333_v43 }
  0x7b   :  { %1045 = vmatpush3.bf16.msra.mxu0 %v1178_v48 }
  0x7c   :  { %1046 = vmatprep.subr.bf16.mxu0 %v1179_v49 }
  0x7d   :  { %1089 = vmatpush3.bf16.msra.mxu1 %v1191_v62 }
  0x7e   :  { %1090 = vmatprep.subr.bf16.mxu1 %v1333_v43 }
  0x7f   :  { %1047 = vmatpush3.bf16.msra.mxu0 %v1180_v52 }
  0x80   :  { %1048 = vmatprep.subr.bf16.mxu0 %v1181_v55 }
  0x81   :  { %1091 = vmatpush3.bf16.msra.mxu1 %v1192_v63 }
  0x82   :  { %1092 = vmatprep.subr.bf16.mxu1 %v1333_v43 }
  0x83   :  { %1049 = vmatpush3.bf16.msra.mxu0 %v1182_v56 }
  0x84   :  { %1050 = vmatprep.subr.bf16.mxu0 %v1183_v57 }
  0x85   :  { %1093 = vmatpush3.bf16.msra.mxu1 %v1193_v0 }
  0x86   :  { %1094 = vmatprep.subr.bf16.mxu1 %v1333_v43 }
  0x87   :  { %1051 = vmatpush3.bf16.msra.mxu0 %v1184_v58 }
  0x88   :  { %1104 = vmatprep.subr.bf16.mxu0 %v1333_v43 }
  0x89   :  { %1095 = vmatpush3.bf16.msra.mxu1 %v1194_v1 }
  0x8a   :  { %625 = vmatmul.mubr.bf16.vlgmr.msra.gmra.mrb[4].mxu0 %v921_v59  ;;  %1096 = vmatprep.subr.bf16.mxu1 %v1333_v43 }
  0x8b   :  { %1120 = vmatprep.mubr.msk.bf16.mxu0 %vm1334_vm0, %v1333_v43  ;;  %1105 = vmatpush3.bf16.msra.mxu0 %v1197_v4 }
  0x8c   :  { %1106 = vmatprep.subr.bf16.mxu0 %v1333_v43 }
  0x8d   :  { %1097 = vmatpush3.bf16.msra.mxu1 %v1195_v2 }
  0x8e   :  { %1098 = vmatprep.subr.bf16.mxu1 %v1333_v43 }
  0x8f   :  { %1107 = vmatpush3.bf16.msra.mxu0 %v1198_v5 }
  0x90   :  { %1108 = vmatprep.subr.bf16.mxu0 %v1333_v43 }
  0x91   :  { %1099 = vmatpush3.bf16.msra.mxu1 %v1196_v3 }
  0x93   :  { %1109 = vmatpush3.bf16.msra.mxu0 %v1199_v6 }
  0x94   :  { %1110 = vmatprep.subr.bf16.mxu0 %v1333_v43 }
  0x97   :  { %1111 = vmatpush3.bf16.msra.mxu0 %v1200_v7 }
  0x98   :  { %1112 = vmatprep.subr.bf16.mxu0 %v1333_v43 }
  0x9b   :  { %1113 = vmatpush3.bf16.msra.mxu0 %v1201_v34 }
  0x9c   :  { %1114 = vmatprep.subr.bf16.mxu0 %v1333_v43 }
  0x9f   :  { %1115 = vmatpush3.bf16.msra.mxu0 %v1202_v35 }
  0xa0   :  { %1116 = vmatprep.subr.bf16.mxu0 %v1333_v43 }
  0xa3   :  { %1117 = vmatpush3.bf16.msra.mxu0 %v1203_v36 }
  0xa4   :  { %1118 = vmatprep.subr.bf16.mxu0 %v1333_v43 }
  0xa7   :  { %1119 = vmatpush3.bf16.msra.mxu0 %v1204_v37 }
 0x13d   :  { %v1008_v8 = vpop.f32.mrb[0].mxu0 }
 0x13e   :  { %v1009_v10 = vpop.f32.mrb[1].mxu0 }
 0x13f   :  { %v1010_v11 = vadd.f32 %v1009_v10, %v1008_v8  ;;  %v1011_v12 = vpop.f32.mrb[2].mxu0  ;;  %v1030_v13 = vpop.f32.mrb[0].mxu1 }
 0x140   :  { %v1012_v14 = vpop.f32.mrb[3].mxu0  ;;  %v1031_v15 = vpop.f32.mrb[1].mxu1 }
 0x141   :  { %v547_v16 = vadd.f32 %v1010_v11, %v916_v9  ;;  %v1032_v17 = vadd.f32 %v1031_v15, %v1030_v13  ;;  %v1033_v18 = vpop.f32.mrb[2].mxu1 }
 0x142   :  { %v1034_v19 = vpop.f32.mrb[3].mxu1 }
 0x143   :  { %v587_v20 = vadd.f32 %v1032_v17, %v547_v16 }
 0x147   :  { %v666_v21 = vpop.f32.mrb[4].mxu1 }
 0x148   :  { %v1082_v22 = vpop.f32.mrb[5].mxu1 }
 0x149   :  { %v669_v23 = vpop.f32.mrb[6].mxu1 }
 0x14a   :  { %v1083_v24 = vpop.f32.mrb[7].mxu1 }
 0x15d   :  { %v1052_v25 = vpop.f32.mrb[4].mxu0 }
 0x15e   :  { %v1053_v26 = vpop.f32.mrb[5].mxu0 }
 0x15f   :  { %v1054_v27 = vadd.f32 %v1053_v26, %v1052_v25  ;;  %v1055_v28 = vpop.f32.mrb[6].mxu0 }
 0x160   :  { %v1056_v29 = vpop.f32.mrb[7].mxu0 }
 0x161   :  { %v627_v30 = vadd.f32 %v1054_v27, %v587_v20 }
 0x163   :  { %v667_v31 = vadd.f32 %v666_v21, %v627_v30 }
 0x165   :  { %1205 = vtanh.f32 %v667_v31 }
 0x16f   :  { %v1206_v32 = vpop.eup %1205 }
 0x170   :  { %v673_v33 = vpack.c.bf16 %v1206_v32, %v1206_v32 }
 0x172   :  { %1101 = vmatmul.mubr.bf16.vlgmr.msra.gmra.mrb[8].mxu1 %v673_v33 }
 0x245   :  { %v779_v39 = vpop.f32.mrb[8].mxu1 }
 0x246   :  { %v780_v40 = vadd.f32 %v974_v38, %v779_v39  ;;  %v1102_v41 = vpop.f32.mrb[9].mxu1 }
 0x247   :  { %v782_v42 = vpop.f32.mrb[10].mxu1 }
 0x248   :  { %1207 = vtanh.f32 %v780_v40  ;;  %v1103_v44 = vpop.f32.mrb[11].mxu1 }
 0x252   :  { %v1208_v45 = vpop.eup %1207 }
 0x253   :  { %v786_v46 = vpack.c.bf16 %v1208_v45, %v1208_v45 }
 0x255   :  { %1121 = vmatmul.mubr.bf16.vlgmr.msra.gmra.mrb[8].mxu0 %v786_v46 }
 0x328   :  { %v892_v43 = vpop.f32.mrb[8].mxu0 }
 0x329   :  { %v893_v48 = vadd.f32 %v983_v47, %v892_v43  ;;  %v1122_v49 = vpop.f32.mrb[9].mxu0 }
 0x32a   :  { %v895_v50 = vpop.f32.mrb[10].mxu0 }
 0x32b   :  { %898 = vst [vmem:[#allocation10] sm:$0xff] %v893_v48  ;;  %v1123_v51 = vpop.f32.mrb[11].mxu0 }
 0x32c   :  { %1308 = shalt.err (!%p1305_p8)
}
 0x32d   :  { %s1309_s6 = scalar_lea.hbm %s1484_s7, 128 }
 0x32e   :  { %p1310_p9 = scmp.ne.s32.totalorder %s1484_s7, %s1309_s6  ;;  %p1313_p10 = scmp.lt.u32.totalorder %s1309_s6, %s1484_s7 }
 0x330   :  { %p1315_p11 = pnand %p1313_p10, %p1310_p9 }
 0x332   :  { %1318 = shalt.err (!%p1315_p11)
}
 0x333   :  { %908 = dma.vmem_to_hbm [thread:$0]  %s906_s29, 128, %s1484_s7, [#allocation4]  }
 0x334   :  { %1325 = dma.done.wait [#allocation4], 128  }
 0x335   :  { %1326 = vsyncadd [#allocation4], 4294967168 }
 0x336   :  { %912 = vsyncpa [#allocation3], 1 }
 0x337   :  { %913 = vsyncpa [#allocation6], 1 }
 0x338   :  { %914 = vsyncpa [#allocation9], 1 }
 0x339   :  { %915 = vsyncpa [#allocation4], 1 }

</bundles_post_ra>
